<compile_context>
chip_gen: v7x
topology: tpu7x:2x2x1
jax: 0.10.0
libtpu: 0.0.40
codegen_flags: <defaults>
</compile_context>

<pallas_src>
import functools

import jax
import jax.numpy as jnp
from jax.experimental import pallas as pl
from jax.experimental.pallas import tpu as pltpu


# ----------------------------------------------------------------------------
# Kernels
# ----------------------------------------------------------------------------
def _ffn_kernel_resident(x_ref, w1_ref, b1_ref, w2_ref, b2_ref, o_ref, *,
                         compute_dtype):
    # Full weights resident in VMEM; 1-D grid over row tiles only.
    x = x_ref[...].astype(compute_dtype)
    h = jnp.dot(x, w1_ref[...].astype(compute_dtype),
                preferred_element_type=jnp.float32)
    h = jnp.maximum(h + b1_ref[...].astype(jnp.float32), 0.0)
    # dropout: identity at inference time (nn.Dropout in eval mode)
    out = jnp.dot(h.astype(compute_dtype), w2_ref[...].astype(compute_dtype),
                  preferred_element_type=jnp.float32)
    o_ref[...] = (out + b2_ref[...].astype(jnp.float32)).astype(o_ref.dtype)


def _ffn_kernel_chunked(x_ref, w1_ref, b1_ref, w2_ref, b2_ref, o_ref, acc_ref,
                        *, compute_dtype):
    # pf dimension chunked on grid axis 1 (reduction); f32 accumulator scratch.
    k = pl.program_id(1)

    @pl.when(k == 0)
    def _init():
        acc_ref[...] = jnp.zeros_like(acc_ref)

    x = x_ref[...].astype(compute_dtype)
    h = jnp.dot(x, w1_ref[...].astype(compute_dtype),
                preferred_element_type=jnp.float32)
    h = jnp.maximum(h + b1_ref[...].astype(jnp.float32), 0.0)
    # dropout: identity at inference time (nn.Dropout in eval mode)
    acc_ref[...] += jnp.dot(h.astype(compute_dtype),
                            w2_ref[...].astype(compute_dtype),
                            preferred_element_type=jnp.float32)

    @pl.when(k == pl.num_programs(1) - 1)
    def _finalize():
        o_ref[...] = (acc_ref[...]
                      + b2_ref[...].astype(jnp.float32)).astype(o_ref.dtype)


# ----------------------------------------------------------------------------
# Wrapper
# ----------------------------------------------------------------------------
def _round_up(n, m):
    return (n + m - 1) // m * m


def _cdiv(a, b):
    return -(-a // b)


def _vmem_capacity_bytes():
    try:
        return int(pltpu.get_tpu_info().vmem_capacity_bytes)
    except Exception:
        return 64 << 20  # conservative (v7x-sized) default


def _pick_tk(pf, tile_k):
    """Largest multiple-of-128 divisor of pf that is <= tile_k (None if none)."""
    best = None
    d = 128
    while d <= min(pf, tile_k):
        if pf % d == 0:
            best = d
        d += 128
    return best


def positionwise_feedforward(x, w1, b1, w2, b2, *, tile_m=None, tile_k=512,
                             compute_dtype=jnp.bfloat16, force_chunked=False):
    """x: (batch, seq, hid). w1: (hid, pf), b1: (pf,), w2: (pf, hid), b2: (hid,)."""
    batch, seq, hid = x.shape
    pf = w1.shape[1]
    rows = batch * seq

    if compute_dtype is None:
        compute_dtype = x.dtype
    compute_dtype = jnp.dtype(compute_dtype)

    x_bytes = jnp.dtype(x.dtype).itemsize
    w_bytes = jnp.dtype(w1.dtype).itemsize

    # --- generation-aware budgets -------------------------------------------
    vmem_cap = _vmem_capacity_bytes()
    big_vmem = vmem_cap >= (100 << 20)          # v5e/v6e (128 MiB) vs v7x (64 MiB)
    budget = int(0.80 * vmem_cap)               # headroom under physical VMEM
    vmem_limit_cap = (110 << 20) if big_vmem else (56 << 20)

    # --- row tile ------------------------------------------------------------
    tm_default = 1024 if big_vmem else 512
    tm = tile_m if tile_m is not None else tm_default
    tm = max(16, min(tm, _round_up(rows, 16)))  # clamp for tiny problems

    # --- VMEM footprint estimates (pipeline double-buffers counted) ----------
    def resident_bytes(tm_):
        return (2 * 2 * hid * pf * w_bytes      # W1 + W2 (conservative 2x buf)
                + 2 * tm_ * hid * x_bytes       # x tiles
                + 2 * tm_ * hid * x_bytes       # out tiles
                + 2 * (pf + hid) * w_bytes)     # biases

    def chunked_bytes(tm_, tk_):
        return (2 * tm_ * hid * x_bytes         # x tiles
                + 2 * tm_ * hid * x_bytes       # out tiles
                + 2 * hid * tk_ * w_bytes       # W1 chunks
                + 2 * tk_ * hid * w_bytes       # W2 chunks
                + 2 * (tk_ + hid) * w_bytes     # bias chunks
                + tm_ * hid * 4)                # f32 accumulator scratch

    use_resident = (not force_chunked) and resident_bytes(tm) <= budget

    pf_eff = pf
    tk = pf
    if not use_resident:
        tk = _pick_tk(pf, tile_k)
        if tk is None:
            # pf not a multiple of 128: zero-pad the pf dim (numerically exact:
            # relu(0) = 0 contributes nothing through the zero W2 rows).
            pf_eff = _round_up(pf, 128)
            w1 = jnp.pad(w1, ((0, 0), (0, pf_eff - pf)))
            b1 = jnp.pad(b1, ((0, pf_eff - pf),))
            w2 = jnp.pad(w2, ((0, pf_eff - pf), (0, 0)))
            tk = _pick_tk(pf_eff, tile_k)
        # Shrink tiles if the chunked footprint still exceeds the budget.
        while chunked_bytes(tm, tk) > budget and tm > 64:
            tm = max(64, tm // 2)
        while chunked_bytes(tm, tk) > budget and tk % 256 == 0:
            tk //= 2

    n_row_tiles = _cdiv(rows, tm)

    x2d = x.reshape(rows, hid)
    b1_2d = b1.reshape(1, pf_eff)
    b2_2d = b2.reshape(1, hid)

    est = resident_bytes(tm) if use_resident else chunked_bytes(tm, tk)
    vmem_limit = int(min(max(1.3 * est + (4 << 20), 32 << 20), vmem_limit_cap))

    weight_passes = 1 if use_resident else n_row_tiles
    cost = pl.CostEstimate(
        flops=4 * rows * hid * pf,                          # two matmuls
        transcendentals=0,
        bytes_accessed=(2 * rows * hid * x_bytes            # x in + y out
                        + weight_passes * 2 * hid * pf_eff * w_bytes
                        + (pf_eff + hid) * w_bytes),
    )

    if use_resident:
        out2d = pl.pallas_call(
            functools.partial(_ffn_kernel_resident, compute_dtype=compute_dtype),
            out_shape=jax.ShapeDtypeStruct((rows, hid), x.dtype),
            grid_spec=pltpu.PrefetchScalarGridSpec(
                num_scalar_prefetch=0,
                grid=(n_row_tiles,),
                in_specs=[
                    pl.BlockSpec((tm, hid), lambda i: (i, 0)),    # x row tile
                    pl.BlockSpec((hid, pf_eff), lambda i: (0, 0)),  # W1 resident
                    pl.BlockSpec((1, pf_eff), lambda i: (0, 0)),    # b1 resident
                    pl.BlockSpec((pf_eff, hid), lambda i: (0, 0)),  # W2 resident
                    pl.BlockSpec((1, hid), lambda i: (0, 0)),       # b2 resident
                ],
                out_specs=pl.BlockSpec((tm, hid), lambda i: (i, 0)),
            ),
            compiler_params=pltpu.CompilerParams(
                dimension_semantics=("parallel",),
                vmem_limit_bytes=vmem_limit,
            ),
            cost_estimate=cost,
        )(x2d, w1, b1_2d, w2, b2_2d)
    else:
        out2d = pl.pallas_call(
            functools.partial(_ffn_kernel_chunked, compute_dtype=compute_dtype),
            out_shape=jax.ShapeDtypeStruct((rows, hid), x.dtype),
            grid_spec=pltpu.PrefetchScalarGridSpec(
                num_scalar_prefetch=0,
                grid=(n_row_tiles, pf_eff // tk),
                in_specs=[
                    pl.BlockSpec((tm, hid), lambda i, k: (i, 0)),   # x row tile
                    pl.BlockSpec((hid, tk), lambda i, k: (0, k)),   # W1[:, k-chunk]
                    pl.BlockSpec((1, tk), lambda i, k: (0, k)),     # b1[k-chunk]
                    pl.BlockSpec((tk, hid), lambda i, k: (k, 0)),   # W2[k-chunk, :]
                    pl.BlockSpec((1, hid), lambda i, k: (0, 0)),    # b2 resident
                ],
                out_specs=pl.BlockSpec((tm, hid), lambda i, k: (i, 0)),
                scratch_shapes=[pltpu.VMEM((tm, hid), jnp.float32)],
            ),
            compiler_params=pltpu.CompilerParams(
                # row axis shards across TCs; pf axis is a reduction.
                dimension_semantics=("parallel", "arbitrary"),
                vmem_limit_bytes=vmem_limit,
            ),
            cost_estimate=cost,
        )(x2d, w1, b1_2d, w2, b2_2d)

    return out2d.reshape(batch, seq, hid)


# ----------------------------------------------------------------------------
# Reference + test
# ----------------------------------------------------------------------------
def _init_params(key, hid_dim, pf_dim, dtype=jnp.float32):
    # Mirrors PyTorch nn.Linear default init: U(-1/sqrt(fan_in), 1/sqrt(fan_in)).
    k1, k2, k3, k4 = jax.random.split(key, 4)
    bound1 = 1.0 / (hid_dim ** 0.5)
    bound2 = 1.0 / (pf_dim ** 0.5)
    w1 = jax.random.uniform(k1, (hid_dim, pf_dim), dtype, -bound1, bound1)
    b1 = jax.random.uniform(k2, (pf_dim,), dtype, -bound1, bound1)
    w2 = jax.random.uniform(k3, (pf_dim, hid_dim), dtype, -bound2, bound2)
    b2 = jax.random.uniform(k4, (hid_dim,), dtype, -bound2, bound2)
    return w1, b1, w2, b2


def _ref(x, w1, b1, w2, b2):
    return jnp.maximum(x @ w1 + b1, 0.0) @ w2 + b2


if __name__ == "__main__":
    key = jax.random.PRNGKey(0)

    # Small shape consistent with the module.
    batch, seq, hid_dim, pf_dim = 2, 8, 32, 64
    kx, kp, kx2, kx3, kp3 = jax.random.split(key, 5)
    x = jax.random.normal(kx, (batch, seq, hid_dim), jnp.float32)
    w1, b1, w2, b2 = _init_params(kp, hid_dim, pf_dim)
    ref = _ref(x, w1, b1, w2, b2)

    # 1) Exact-precision path (f32 compute) — tight tolerance, resident weights.
    out = jax.block_until_ready(
        positionwise_feedforward(x, w1, b1, w2, b2, compute_dtype=jnp.float32))
    assert out.shape == (batch, seq, hid_dim)
    assert jnp.allclose(out, ref, atol=1e-5, rtol=1e-5)

    # 2) Default bf16-compute path — loose tolerance.
    out_bf = jax.block_until_ready(positionwise_feedforward(x, w1, b1, w2, b2))
    assert jnp.allclose(out_bf, ref, atol=2e-2, rtol=2e-2)

    # 3) Ragged row count (batch*seq not a multiple of the row tile) exercises
    #    the masked partial last row tile (no host-side pad/slice anymore).
    x2 = jax.random.normal(kx2, (2, 5, hid_dim), jnp.float32)
    out2 = jax.block_until_ready(
        positionwise_feedforward(x2, w1, b1, w2, b2, compute_dtype=jnp.float32))
    assert out2.shape == (2, 5, hid_dim)
    assert jnp.allclose(out2, _ref(x2, w1, b1, w2, b2), atol=1e-5, rtol=1e-5)

    # 4) Force the chunked-k (accumulator) path to validate it at small shapes.
    hid3, pf3 = 128, 256
    x3 = jax.random.normal(kx3, (2, 8, hid3), jnp.float32)
    w13, b13, w23, b23 = _init_params(kp3, hid3, pf3)
    out3 = jax.block_until_ready(
        positionwise_feedforward(x3, w13, b13, w23, b23, tile_k=128,
                                 compute_dtype=jnp.float32, force_chunked=True))
    assert jnp.allclose(out3, _ref(x3, w13, b13, w23, b23), atol=1e-4, rtol=1e-4)

    print("KERNEL_OK")
</pallas_src>

<mosaic_0001>
module attributes {stable_mosaic.version = 11 : i64} {
  func.func @_ffn_kernel_resident(%arg0: i32, %arg1: memref<16x32xf32, #tpu.memory_space<vmem>>, %arg2: memref<32x64xf32, #tpu.memory_space<vmem>>, %arg3: memref<1x64xf32, #tpu.memory_space<vmem>>, %arg4: memref<64x32xf32, #tpu.memory_space<vmem>>, %arg5: memref<1x32xf32, #tpu.memory_space<vmem>>, %arg6: memref<16x32xf32, #tpu.memory_space<vmem>>) attributes {dimension_semantics = [#tpu.dimension_semantics<parallel>], iteration_bounds = array<i64: 1>, scalar_prefetch = 0 : i64, scratch_operands = 0 : i64, tpu.core_type = #tpu.core_type<tc>, window_params = [{transform_indices = @transform_0, window_bounds = array<i64: 16, 32>}, {pipeline_mode = #tpu.pipeline_mode<synchronous>, transform_indices = @transform_1, window_bounds = array<i64: 32, 64>}, {pipeline_mode = #tpu.pipeline_mode<synchronous>, transform_indices = @transform_2, window_bounds = array<i64: 1, 64>}, {pipeline_mode = #tpu.pipeline_mode<synchronous>, transform_indices = @transform_3, window_bounds = array<i64: 64, 32>}, {pipeline_mode = #tpu.pipeline_mode<synchronous>, transform_indices = @transform_4, window_bounds = array<i64: 1, 32>}, {transform_indices = @transform_5, window_bounds = array<i64: 16, 32>}]} {
    %c0 = arith.constant 0 : index
    %c0_0 = arith.constant 0 : index
    %0 = vector.load %arg1[%c0, %c0_0] : memref<16x32xf32, #tpu.memory_space<vmem>>, vector<16x32xf32>
    %c0_1 = arith.constant 0 : index
    %c0_2 = arith.constant 0 : index
    %1 = vector.load %arg2[%c0_1, %c0_2] : memref<32x64xf32, #tpu.memory_space<vmem>>, vector<32x64xf32>
    %cst = arith.constant dense<0.000000e+00> : vector<16x64xf32>
    %2 = tpu.matmul %0, %1, %cst {dimension_numbers = #tpu.dot_dimension_numbers<[1], [0], [0], [1], [0, 0, 1, 1], [], []>} : vector<16x32xf32>, vector<32x64xf32>, vector<16x64xf32> -> vector<16x64xf32>
    %c0_3 = arith.constant 0 : index
    %c0_4 = arith.constant 0 : index
    %3 = vector.load %arg3[%c0_3, %c0_4] : memref<1x64xf32, #tpu.memory_space<vmem>>, vector<1x64xf32>
    %4 = vector.broadcast %3 : vector<1x64xf32> to vector<16x64xf32>
    %5 = arith.addf %2, %4 : vector<16x64xf32>
    %cst_5 = arith.constant 0.000000e+00 : f32
    %6 = vector.broadcast %cst_5 : f32 to vector<16x64xf32>
    %7 = arith.maximumf %5, %6 : vector<16x64xf32>
    %c0_6 = arith.constant 0 : index
    %c0_7 = arith.constant 0 : index
    %8 = vector.load %arg4[%c0_6, %c0_7] : memref<64x32xf32, #tpu.memory_space<vmem>>, vector<64x32xf32>
    %cst_8 = arith.constant dense<0.000000e+00> : vector<16x32xf32>
    %9 = tpu.matmul %7, %8, %cst_8 {dimension_numbers = #tpu.dot_dimension_numbers<[1], [0], [0], [1], [0, 0, 1, 1], [], []>} : vector<16x64xf32>, vector<64x32xf32>, vector<16x32xf32> -> vector<16x32xf32>
    %c0_9 = arith.constant 0 : index
    %c0_10 = arith.constant 0 : index
    %10 = vector.load %arg5[%c0_9, %c0_10] : memref<1x32xf32, #tpu.memory_space<vmem>>, vector<1x32xf32>
    %11 = vector.broadcast %10 : vector<1x32xf32> to vector<16x32xf32>
    %12 = arith.addf %9, %11 : vector<16x32xf32>
    %c0_11 = arith.constant 0 : index
    %c0_12 = arith.constant 0 : index
    %13 = vector.load %arg6[%c0_11, %c0_12] : memref<16x32xf32, #tpu.memory_space<vmem>>, vector<16x32xf32>
    tpu.vector_store %arg6[%c0_11, %c0_12], %12 {strides = array<i32>} : memref<16x32xf32, #tpu.memory_space<vmem>>, vector<16x32xf32>,
    return
  }
  func.func @transform_0(%arg0: i32) -> (i32, i32) {
    %c0_i32 = arith.constant 0 : i32
    %c0_i32_0 = arith.constant 0 : i32
    return %arg0, %c0_i32 : i32, i32
  }
  func.func @transform_1(%arg0: i32) -> (i32, i32) {
    %c0_i32 = arith.constant 0 : i32
    %c0_i32_0 = arith.constant 0 : i32
    %c0_i32_1 = arith.constant 0 : i32
    return %c0_i32, %c0_i32_0 : i32, i32
  }
  func.func @transform_2(%arg0: i32) -> (i32, i32) {
    %c0_i32 = arith.constant 0 : i32
    %c0_i32_0 = arith.constant 0 : i32
    %c0_i32_1 = arith.constant 0 : i32
    return %c0_i32, %c0_i32_0 : i32, i32
  }
  func.func @transform_3(%arg0: i32) -> (i32, i32) {
    %c0_i32 = arith.constant 0 : i32
    %c0_i32_0 = arith.constant 0 : i32
    %c0_i32_1 = arith.constant 0 : i32
    return %c0_i32, %c0_i32_0 : i32, i32
  }
  func.func @transform_4(%arg0: i32) -> (i32, i32) {
    %c0_i32 = arith.constant 0 : i32
    %c0_i32_0 = arith.constant 0 : i32
    %c0_i32_1 = arith.constant 0 : i32
    return %c0_i32, %c0_i32_0 : i32, i32
  }
  func.func @transform_5(%arg0: i32) -> (i32, i32) {
    %c0_i32 = arith.constant 0 : i32
    %c0_i32_0 = arith.constant 0 : i32
    return %arg0, %c0_i32 : i32, i32
  }
}

</mosaic_0001>

<bundles_post_ra>
// kernel: tpu_custom_call.1
= control target key start
LH: loop header
LB: loop body
LE: loop exit
PB: predicated region body
PF: predicated region fallthrough
CT: control target
= control target key end

     0   :  { %vm34_vm0 = vcmask 261120   ;;  %s433_s0 = inlined_call_operand.vmem [shape: f32[16,32], index: 0, kind: input, shape index: {}]   ;;  %s434_s1 = inlined_call_operand.vmem [shape: f32[32,64], index: 1, kind: input, shape index: {}]   ;;  %s435_s2 = inlined_call_operand.vmem [shape: f32[1,64], index: 2, kind: input, shape index: {}]   ;;  %s436_s3 = inlined_call_operand.vmem [shape: f32[64,32], index: 3, kind: input, shape index: {}]   ;;  %s437_s4 = inlined_call_operand.vmem [shape: f32[1,32], index: 4, kind: input, shape index: {}]   ;;  %s438_s5 = inlined_call_operand.hbm [shape: f32[16,32], index: 5, kind: output, shape index: {}]  }
   0x1   :  { %v23_v0 = vld [vmem:[%s434_s1] sm:$0xff]  ;;  %v24_v1 = vld [vmem:[%s434_s1 + $0x8] sm:$0xff]  ;;  %v25_v2 = vld [vmem:[%s434_s1 + $0x10] sm:$0xff] }
   0x2   :  { %v285_v3 = vpack.c.bf16 %v24_v1, %v23_v0  ;;  %v26_v4 = vld [vmem:[%s434_s1 + $0x18] sm:$0xff]  ;;  %v21_v5 = vld [vmem:[%s433_s0] sm:$0xff]  ;;  %v119_v8 = vld [vmem:[%s436_s3 + $0x8] sm:$0xff] }
   0x3   :  { %v289_v6 = vpack.c.bf16 %v26_v4, %v25_v2  ;;  %263 = vmatprep.mubr.msk.f32.mxu0 %vm34_vm0, %v21_v5  ;;  %v118_v7 = vld [vmem:[%s436_s3] sm:$0xff]  ;;  %v120_v9 = vld [vmem:[%s436_s3 + $0x10] sm:$0xff]  ;;  %v121_v11 = vld [vmem:[%s436_s3 + $0x18] sm:$0xff] }
   0x4   :  { %286 = vmatprep.subr.bf16.mxu0 %v285_v3  ;;  %v293_v10 = vpack.c.bf16 %v119_v8, %v118_v7  ;;  %v297_v12 = vpack.c.bf16 %v121_v11, %v120_v9  ;;  %v122_v13 = vld [vmem:[%s436_s3 + $0x20] sm:$0xff]  ;;  %v123_v14 = vld [vmem:[%s436_s3 + $0x28] sm:$0xff] }
   0x5   :  { %288 = vmatpush3.bf16.msra.mxu0 %v285_v3 }
   0x6   :  { %10 = vsyncpa [#allocation3], 0  ;;  %290 = vmatprep.subr.bf16.mxu0 %v289_v6  ;;  %294 = vmatprep.subr.bf16.mxu1 %v293_v10  ;;  %v301_v15 = vpack.c.bf16 %v123_v14, %v122_v13  ;;  %v22_v16 = vld [vmem:[%s433_s0 + $0x8] sm:$0xff]  ;;  %v124_v17 = vld [vmem:[%s436_s3 + $0x30] sm:$0xff]  ;;  %vm133_vm1 = vcmask 523264  }
   0x7   :  { %296 = vmatpush3.bf16.msra.mxu1 %v293_v10  ;;  %v125_v18 = vld [vmem:[%s436_s3 + $0x38] sm:$0xff]  ;;  %v233_v20 = vld [vmem:[%s435_s2] ss:$0 sm:$0xff]  ;;  %s336_s3 = smov [#allocation2]  }
   0x8   :  { %298 = vmatprep.subr.bf16.mxu1 %v297_v12  ;;  %v305_v19 = vpack.c.bf16 %v125_v18, %v124_v17  ;;  %v236_v27 = vld [vmem:[%s437_s4] ss:$0 sm:$0xff]  ;;  %s222_s23 = sshll.u32 %s336_s3, 4  ;;  %s223_s23 = int_to_ptr.vmem [resolvable:$true] %s222_s23 }
   0x9   :  { %292 = vmatpush3.bf16.msra.mxu0 %v289_v6  ;;  %s312_s2 = scalar_lea.vmem %s223_s23, 256  ;;  %p317_p1 = scmp.lt.s32.totalorder %s223_s23, %s223_s23 }
   0xa   :  { %p313_p0 = scmp.ne.s32.totalorder %s223_s23, %s312_s2  ;;  %p318_p2 = scmp.lt.s32.totalorder %s312_s2, %s312_s2 }
   0xb   :  { %300 = vmatpush3.bf16.msra.mxu1 %v297_v12 }
   0xc   :  { %264 = vmatmul.mubr.msk.f32.vlgmr.msra.gmra.mrb[0].mxu0 %vm34_vm0, %v22_v16  ;;  %302 = vmatprep.subr.bf16.mxu1 %v301_v15  ;;  %p319_p3 = por %p318_p2, %p317_p1 }
   0xe   :  { %p320_p4 = pnand %p319_p3, %p313_p0 }
   0xf   :  { %304 = vmatpush3.bf16.msra.mxu1 %v301_v15 }
  0x10   :  { %306 = vmatprep.subr.bf16.mxu1 %v305_v19 }
  0x13   :  { %308 = vmatpush3.bf16.msra.mxu1 %v305_v19 }
  0xdf   :  { %v265_v21 = vpop.f32.mrb[0].mxu0 }
  0xe0   :  { %v113_v22 = vadd.f32 %v265_v21, %v233_v20  ;;  %v107_v23 = vpop.f32.mrb[1].mxu0 }
  0xe1   :  { %v108_v24 = vadd.f32 %v233_v20, %v107_v23 }
  0xe2   :  { %v117_v26 = vmax.f32 %v113_v22, 0.0 }
  0xe3   :  { %v116_v25 = vmax.f32 %v108_v24, 0.0 }
  0xe5   :  { %282 = vmatprep.mubr.msk.f32.mxu1 %vm133_vm1, %v116_v25 }
  0xe6   :  { %283 = vmatmul.mubr.msk.f32.vlgmr.msra.gmra.mrb[0].mxu1 %vm133_vm1, %v117_v26 }
 0x1b9   :  { %v284_v28 = vpop.f32.mrb[0].mxu1 }
 0x1ba   :  { %v212_v29 = vadd.f32 %v284_v28, %v236_v27  ;;  %v206_v30 = vpop.f32.mrb[1].mxu1 }
 0x1bb   :  { %v207_v31 = vadd.f32 %v236_v27, %v206_v30 }
 0x1bc   :  { %216 = vst.msk [vmem:[#allocation2 + $0x8] sm:$0xff] %vm34_vm0, %v212_v29 }
 0x1bd   :  { %215 = vst.msk [vmem:[#allocation2] sm:$0xff] %vm34_vm0, %v207_v31 }
 0x1be   :  { %323 = shalt.err (!%p320_p4)
}
 0x1bf   :  { %s324_s25 = scalar_lea.hbm %s438_s5, 256 }
 0x1c0   :  { %p325_p5 = scmp.ne.s32.totalorder %s438_s5, %s324_s25  ;;  %p328_p6 = scmp.lt.u32.totalorder %s324_s25, %s438_s5 }
 0x1c2   :  { %p330_p7 = pnand %p328_p6, %p325_p5 }
 0x1c4   :  { %333 = shalt.err (!%p330_p7)
}
 0x1c5   :  { %s337_s30 = smov 128   ;;  %s338_s6 = smov 8  }
 0x1c6   :  { %228 = dma.vmem_to_hbm [thread:$0]  %s223_s23, 256, %s438_s5, [#allocation3], %s337_s30, %s337_s30, %s338_s6  }
 0x1c7   :  { %334 = dma.done.wait [#allocation3], 256  }
 0x1c8   :  { %335 = vsyncadd [#allocation3], 4294967040 }
 0x1c9   :  { %232 = vsyncpa [#allocation3], 1 }

</bundles_post_ra>
